<compile_context>
chip_gen: v5e
topology: v5e:2x2
jax: 0.10.0
libtpu: 0.0.40
codegen_flags: <defaults>
</compile_context>

<pallas_src>
import functools

import jax
import jax.numpy as jnp
from jax.experimental import pallas as pl
from jax.experimental.pallas import tpu as pltpu

HIDDEN = 256
LANE = 128
SUBLANE = 8


def _round_up(x, m):
    return (x + m - 1) // m * m


def actor_kernel(s_ref, w1_ref, b1_ref, w2_ref, b2_ref, w3_ref, b3_ref,
                 o_ref, *, max_action):
    # Layer 1: [TB, S] @ [S, H]  (bf16 MXU, f32 accumulate), f32 bias + relu.
    x = s_ref[...].astype(jnp.bfloat16)
    h1 = jnp.dot(x, w1_ref[...], preferred_element_type=jnp.float32)
    h1 = jnp.maximum(h1 + b1_ref[...], 0.0)

    # Layer 2: [TB, H] @ [H, H]
    h2 = jnp.dot(h1.astype(jnp.bfloat16), w2_ref[...],
                 preferred_element_type=jnp.float32)
    h2 = jnp.maximum(h2 + b2_ref[...], 0.0)

    # Layer 3: [TB, H] @ [H, Npad]; tanh on the EUP, scale, lane-dense store.
    a = jnp.dot(h2.astype(jnp.bfloat16), w3_ref[...],
                preferred_element_type=jnp.float32)
    a = jnp.tanh(a + b3_ref[...])
    o_ref[...] = (a * max_action).astype(o_ref.dtype)


@functools.partial(jax.jit, static_argnames=("max_action", "block_b"))
def actor_forward(state, params, max_action, *, block_b=256):
    """state: [B, state_dim] f32. Returns [B, action_dim] f32."""
    w1, b1, w2, b2, w3, b3 = params
    B, state_dim = state.shape
    hidden = w1.shape[1]
    action_dim = w3.shape[1]

    # Lane-dense padded output width (multiple of 128).
    n_pad = max(LANE, _round_up(action_dim, LANE))

    # Batch tile: multiple of 8 sublanes, capped at block_b; pad B to a tile
    # multiple so every grid step sees a full block.
    tb = min(_round_up(block_b, SUBLANE), _round_up(B, SUBLANE))
    b_pad = _round_up(B, tb)
    grid_b = b_pad // tb

    # bf16 weights for the MXU; biases stay f32 for the VPU adds.
    w1b = w1.astype(jnp.bfloat16)
    w2b = w2.astype(jnp.bfloat16)
    w3b = jnp.zeros((hidden, n_pad), jnp.bfloat16)
    w3b = w3b.at[:, :action_dim].set(w3.astype(jnp.bfloat16))
    b3p = jnp.zeros((1, n_pad), jnp.float32).at[:, :action_dim].set(b3)

    state_p = state
    if b_pad != B:
        state_p = jnp.zeros((b_pad, state_dim), state.dtype).at[:B].set(state)

    kernel = functools.partial(actor_kernel, max_action=float(max_action))

    flops_per_row = 2 * (state_dim * hidden + hidden * hidden + hidden * n_pad)
    cost = pl.CostEstimate(
        flops=b_pad * flops_per_row,
        transcendentals=b_pad * n_pad,
        bytes_accessed=(b_pad * state_dim * 4 + b_pad * n_pad * 4
                        + (state_dim + hidden + hidden) * hidden * 2
                        + hidden * n_pad * 2),
    )

    out = pl.pallas_call(
        kernel,
        out_shape=jax.ShapeDtypeStruct((b_pad, n_pad), jnp.float32),
        grid_spec=pltpu.PrefetchScalarGridSpec(
            num_scalar_prefetch=0,
            grid=(grid_b,),
            in_specs=[
                # State tile: streamed over the batch grid axis.
                pl.BlockSpec((tb, state_dim), lambda i: (i, 0)),
                # Weights/biases: constant index_map -> VMEM-resident, DMA'd once.
                pl.BlockSpec((state_dim, hidden), lambda i: (0, 0)),
                pl.BlockSpec((1, hidden), lambda i: (0, 0)),
                pl.BlockSpec((hidden, hidden), lambda i: (0, 0)),
                pl.BlockSpec((1, hidden), lambda i: (0, 0)),
                pl.BlockSpec((hidden, n_pad), lambda i: (0, 0)),
                pl.BlockSpec((1, n_pad), lambda i: (0, 0)),
            ],
            out_specs=pl.BlockSpec((tb, n_pad), lambda i: (i, 0)),
        ),
        compiler_params=pltpu.CompilerParams(
            dimension_semantics=("parallel",)),  # shard batch tiles across TCs
        cost_estimate=cost,
    )(state_p, w1b, b1, w2b, b2, w3b, b3p)

    return out[:B, :action_dim]


def init_actor_params(key, state_dim, action_dim):
    """Deterministic init mimicking PyTorch's default Linear init
    (uniform(-1/sqrt(fan_in), 1/sqrt(fan_in))). Weights stored as
    [in_features, out_features]."""
    def linear(key, fan_in, fan_out):
        kw, kb = jax.random.split(key)
        bound = 1.0 / jnp.sqrt(fan_in)
        w = jax.random.uniform(kw, (fan_in, fan_out), jnp.float32, -bound, bound)
        b = jax.random.uniform(kb, (1, fan_out), jnp.float32, -bound, bound)
        return w, b

    k1, k2, k3 = jax.random.split(key, 3)
    w1, b1 = linear(k1, state_dim, HIDDEN)
    w2, b2 = linear(k2, HIDDEN, HIDDEN)
    w3, b3 = linear(k3, HIDDEN, action_dim)
    return (w1, b1, w2, b2, w3, b3)


def actor_reference(state, params, max_action):
    w1, b1, w2, b2, w3, b3 = params
    x = jnp.maximum(state @ w1 + b1, 0.0)
    x = jnp.maximum(x @ w2 + b2, 0.0)
    return jnp.tanh(x @ w3 + b3) * max_action


if __name__ == "__main__":
    key = jax.random.PRNGKey(0)
    k_state, k_params = jax.random.split(key)

    batch = 64
    state_dim = 16
    action_dim = 4
    max_action = 2.0

    state = jax.random.normal(k_state, (batch, state_dim), jnp.float32)
    params = init_actor_params(k_params, state_dim, action_dim)

    # block_b=32 so the demo exercises a multi-step batch grid (2 tiles).
    out = actor_forward(state, params, max_action, block_b=32)
    out = jax.block_until_ready(out)

    ref = actor_reference(state, params, max_action)
    assert out.shape == (batch, action_dim)
    # bf16 MXU operands -> loosen tolerance vs. f32 reference (output scale ~2).
    max_err = float(jnp.max(jnp.abs(out - ref)))
    assert max_err < 3e-2, f"mismatch vs reference: max abs err {max_err}"

    print("KERNEL_OK")
</pallas_src>

<mosaic_0001>
module attributes {stable_mosaic.version = 11 : i64} {
  func.func @actor_kernel(%arg0: i32, %arg1: memref<32x16xf32, #tpu.memory_space<vmem>>, %arg2: memref<16x256xbf16, #tpu.memory_space<vmem>>, %arg3: memref<1x256xf32, #tpu.memory_space<vmem>>, %arg4: memref<256x256xbf16, #tpu.memory_space<vmem>>, %arg5: memref<1x256xf32, #tpu.memory_space<vmem>>, %arg6: memref<256x128xbf16, #tpu.memory_space<vmem>>, %arg7: memref<1x128xf32, #tpu.memory_space<vmem>>, %arg8: memref<32x128xf32, #tpu.memory_space<vmem>>) attributes {dimension_semantics = [#tpu.dimension_semantics<parallel>], iteration_bounds = array<i64: 2>, scalar_prefetch = 0 : i64, scratch_operands = 0 : i64, tpu.core_type = #tpu.core_type<tc>, window_params = [{transform_indices = @transform_0, window_bounds = array<i64: 32, 16>}, {pipeline_mode = #tpu.pipeline_mode<synchronous>, transform_indices = @transform_1, window_bounds = array<i64: 16, 256>}, {pipeline_mode = #tpu.pipeline_mode<synchronous>, transform_indices = @transform_2, window_bounds = array<i64: 1, 256>}, {pipeline_mode = #tpu.pipeline_mode<synchronous>, transform_indices = @transform_3, window_bounds = array<i64: 256, 256>}, {pipeline_mode = #tpu.pipeline_mode<synchronous>, transform_indices = @transform_4, window_bounds = array<i64: 1, 256>}, {pipeline_mode = #tpu.pipeline_mode<synchronous>, transform_indices = @transform_5, window_bounds = array<i64: 256, 128>}, {pipeline_mode = #tpu.pipeline_mode<synchronous>, transform_indices = @transform_6, window_bounds = array<i64: 1, 128>}, {transform_indices = @transform_7, window_bounds = array<i64: 32, 128>}]} {
    %c0 = arith.constant 0 : index
    %c0_0 = arith.constant 0 : index
    %0 = vector.load %arg1[%c0, %c0_0] : memref<32x16xf32, #tpu.memory_space<vmem>>, vector<32x16xf32>
    %1 = arith.truncf %0 : vector<32x16xf32> to vector<32x16xbf16>
    %c0_1 = arith.constant 0 : index
    %c0_2 = arith.constant 0 : index
    %2 = vector.load %arg2[%c0_1, %c0_2] : memref<16x256xbf16, #tpu.memory_space<vmem>>, vector<16x256xbf16>
    %cst = arith.constant dense<0.000000e+00> : vector<32x256xf32>
    %3 = tpu.matmul %1, %2, %cst {dimension_numbers = #tpu.dot_dimension_numbers<[1], [0], [0], [1], [0, 0, 1, 1], [], []>} : vector<32x16xbf16>, vector<16x256xbf16>, vector<32x256xf32> -> vector<32x256xf32>
    %c0_3 = arith.constant 0 : index
    %c0_4 = arith.constant 0 : index
    %4 = vector.load %arg3[%c0_3, %c0_4] : memref<1x256xf32, #tpu.memory_space<vmem>>, vector<1x256xf32>
    %5 = vector.broadcast %4 : vector<1x256xf32> to vector<32x256xf32>
    %6 = arith.addf %3, %5 : vector<32x256xf32>
    %cst_5 = arith.constant 0.000000e+00 : f32
    %7 = vector.broadcast %cst_5 : f32 to vector<32x256xf32>
    %8 = arith.maximumf %6, %7 : vector<32x256xf32>
    %9 = arith.truncf %8 : vector<32x256xf32> to vector<32x256xbf16>
    %c0_6 = arith.constant 0 : index
    %c0_7 = arith.constant 0 : index
    %10 = vector.load %arg4[%c0_6, %c0_7] : memref<256x256xbf16, #tpu.memory_space<vmem>>, vector<256x256xbf16>
    %cst_8 = arith.constant dense<0.000000e+00> : vector<32x256xf32>
    %11 = tpu.matmul %9, %10, %cst_8 {dimension_numbers = #tpu.dot_dimension_numbers<[1], [0], [0], [1], [0, 0, 1, 1], [], []>} : vector<32x256xbf16>, vector<256x256xbf16>, vector<32x256xf32> -> vector<32x256xf32>
    %c0_9 = arith.constant 0 : index
    %c0_10 = arith.constant 0 : index
    %12 = vector.load %arg5[%c0_9, %c0_10] : memref<1x256xf32, #tpu.memory_space<vmem>>, vector<1x256xf32>
    %13 = vector.broadcast %12 : vector<1x256xf32> to vector<32x256xf32>
    %14 = arith.addf %11, %13 : vector<32x256xf32>
    %cst_11 = arith.constant 0.000000e+00 : f32
    %15 = vector.broadcast %cst_11 : f32 to vector<32x256xf32>
    %16 = arith.maximumf %14, %15 : vector<32x256xf32>
    %17 = arith.truncf %16 : vector<32x256xf32> to vector<32x256xbf16>
    %c0_12 = arith.constant 0 : index
    %c0_13 = arith.constant 0 : index
    %18 = vector.load %arg6[%c0_12, %c0_13] : memref<256x128xbf16, #tpu.memory_space<vmem>>, vector<256x128xbf16>
    %cst_14 = arith.constant dense<0.000000e+00> : vector<32x128xf32>
    %19 = tpu.matmul %17, %18, %cst_14 {dimension_numbers = #tpu.dot_dimension_numbers<[1], [0], [0], [1], [0, 0, 1, 1], [], []>} : vector<32x256xbf16>, vector<256x128xbf16>, vector<32x128xf32> -> vector<32x128xf32>
    %c0_15 = arith.constant 0 : index
    %c0_16 = arith.constant 0 : index
    %20 = vector.load %arg7[%c0_15, %c0_16] : memref<1x128xf32, #tpu.memory_space<vmem>>, vector<1x128xf32>
    %21 = vector.broadcast %20 : vector<1x128xf32> to vector<32x128xf32>
    %22 = arith.addf %19, %21 : vector<32x128xf32>
    %23 = math.tanh %22 : vector<32x128xf32>
    %cst_17 = arith.constant 2.000000e+00 : f32
    %24 = vector.broadcast %cst_17 : f32 to vector<32x128xf32>
    %25 = arith.mulf %23, %24 : vector<32x128xf32>
    %c0_18 = arith.constant 0 : index
    %c0_19 = arith.constant 0 : index
    %26 = vector.load %arg8[%c0_18, %c0_19] : memref<32x128xf32, #tpu.memory_space<vmem>>, vector<32x128xf32>
    tpu.vector_store %arg8[%c0_18, %c0_19], %25 {strides = array<i32>} : memref<32x128xf32, #tpu.memory_space<vmem>>, vector<32x128xf32>,
    return
  }
  func.func @transform_0(%arg0: i32) -> (i32, i32) {
    %c0_i32 = arith.constant 0 : i32
    %c0_i32_0 = arith.constant 0 : i32
    return %arg0, %c0_i32 : i32, i32
  }
  func.func @transform_1(%arg0: i32) -> (i32, i32) {
    %c0_i32 = arith.constant 0 : i32
    %c0_i32_0 = arith.constant 0 : i32
    %c0_i32_1 = arith.constant 0 : i32
    return %c0_i32, %c0_i32_0 : i32, i32
  }
  func.func @transform_2(%arg0: i32) -> (i32, i32) {
    %c0_i32 = arith.constant 0 : i32
    %c0_i32_0 = arith.constant 0 : i32
    %c0_i32_1 = arith.constant 0 : i32
    return %c0_i32, %c0_i32_0 : i32, i32
  }
  func.func @transform_3(%arg0: i32) -> (i32, i32) {
    %c0_i32 = arith.constant 0 : i32
    %c0_i32_0 = arith.constant 0 : i32
    %c0_i32_1 = arith.constant 0 : i32
    return %c0_i32, %c0_i32_0 : i32, i32
  }
  func.func @transform_4(%arg0: i32) -> (i32, i32) {
    %c0_i32 = arith.constant 0 : i32
    %c0_i32_0 = arith.constant 0 : i32
    %c0_i32_1 = arith.constant 0 : i32
    return %c0_i32, %c0_i32_0 : i32, i32
  }
  func.func @transform_5(%arg0: i32) -> (i32, i32) {
    %c0_i32 = arith.constant 0 : i32
    %c0_i32_0 = arith.constant 0 : i32
    %c0_i32_1 = arith.constant 0 : i32
    return %c0_i32, %c0_i32_0 : i32, i32
  }
  func.func @transform_6(%arg0: i32) -> (i32, i32) {
    %c0_i32 = arith.constant 0 : i32
    %c0_i32_0 = arith.constant 0 : i32
    %c0_i32_1 = arith.constant 0 : i32
    return %c0_i32, %c0_i32_0 : i32, i32
  }
  func.func @transform_7(%arg0: i32) -> (i32, i32) {
    %c0_i32 = arith.constant 0 : i32
    %c0_i32_0 = arith.constant 0 : i32
    return %arg0, %c0_i32 : i32, i32
  }
}

</mosaic_0001>

<bundles_post_ra>
// kernel: actor_forward.1
= control target key start
LH: loop header
LB: loop body
LE: loop exit
PB: predicated region body
PF: predicated region fallthrough
CT: control target
= control target key end

     0   :  { %s1234_s24 = smov 0   ;;  %s1529_s0 = inlined_call_operand.vmem [shape: f32[64,16], index: 0, kind: input, shape index: {}]   ;;  %s1530_s1 = inlined_call_operand.vmem [shape: bf16[16,256], index: 1, kind: input, shape index: {}]   ;;  %s1531_s2 = inlined_call_operand.vmem [shape: f32[1,256], index: 2, kind: input, shape index: {}]   ;;  %s1532_s3 = inlined_call_operand.vmem [shape: bf16[256,256], index: 3, kind: input, shape index: {}]   ;;  %s1533_s4 = inlined_call_operand.vmem [shape: f32[1,256], index: 4, kind: input, shape index: {}]   ;;  %s1534_s5 = inlined_call_operand.vmem [shape: bf16[256,128], index: 5, kind: input, shape index: {}]   ;;  %s1535_s6 = inlined_call_operand.vmem [shape: f32[1,128], index: 6, kind: input, shape index: {}]   ;;  %s1536_s7 = inlined_call_operand.vmem [shape: f32[64,128], index: 7, kind: output, shape index: {}]  }
   0x1 LB: > { %s888_s25 = sadd.s32 4294967295, %s1192_s24   ;;  %p892_p0 = scmp.ge.s32.totalorder %s1192_s24, 1  ;;  %s1192_s24 = sphi %s1234_s24, %s17_s24  }
   0x2   : > { %p238_p1 = scmp.lt.s32.totalorder %s1192_s24, 3 }
   0x4   : > { %p239_p2 = pnand %p892_p0, %p238_p1 }
   0x5   : > { %s893_s11 = sshll.u32 (!%p239_p2), %s888_s25, 2 }
   0x6   : > { %242 = sbr.rel (%p239_p2) target bundleno = 481 (0x1e1), region = 48  ;;  %p271_p3 = scmp.lt.s32.totalorder (!%p239_p2), %s893_s11, 7 }
   0xb   : > { %v899_v0 = vld [vmem:[%s1530_s1] sm:$0xf]  ;;  %v1104_v1 = vld [vmem:[%s1530_s1 + $0x4] sm:$0xf0]  ;;  %v1103_v2 = vld [vmem:[%s1530_s1 + $0x4] sm:$0xf] }
   0xc   : > { %v900_v3 = vor.u32 %v1104_v1, %v899_v0  ;;  %v901_v4 = vld [vmem:[%s1530_s1 + $0x8] sm:$0xf0]  ;;  %v967_v5 = vld [vmem:[%s1532_s3 + $0x70] sm:$0xf]  ;;  %v1120_v7 = vld [vmem:[%s1532_s3 + $0x74] sm:$0xf0] }
   0xd   : > { %v904_v6 = vor.u32 %v1103_v2, %v901_v4  ;;  %v1031_v8 = vld [vmem:[%s1532_s3 + $0xf0] sm:$0xf]  ;;  %v968_v9 = vor.u32 %v1120_v7, %v967_v5  ;;  %v1136_v10 = vld [vmem:[%s1532_s3 + $0xf4] sm:$0xf0]  ;;  %v1119_v11 = vld [vmem:[%s1532_s3 + $0x74] sm:$0xf] }
   0xe   : > { %321 = vmatpush.bf16.msra.mxu0 %v900_v3  ;;  %v969_v12 = vld [vmem:[%s1532_s3 + $0x78] sm:$0xf0]  ;;  %s1538_s11 = smov (!%p271_p3, %s893_s11), 7  ;;  %v1032_v13 = vor.u32 %v1136_v10, %v1031_v8  ;;  %v1135_v15 = vld [vmem:[%s1532_s3 + $0xf4] sm:$0xf]  ;;  %vm307_vm0 = vcmask 130048  }
   0xf   : > { %340 = vmatpush.bf16.msra.mxu1 %v904_v6  ;;  %v972_v14 = vor.u32 %v1119_v11, %v969_v12  ;;  %v1033_v16 = vld [vmem:[%s1532_s3 + $0xf8] sm:$0xf0]  ;;  %562 = vmatpush.bf16.msra.mxu2 %v968_v9  ;;  %v959_v18 = vld [vmem:[%s1532_s3 + $0x60] sm:$0xf]  ;;  %v1118_v19 = vld [vmem:[%s1532_s3 + $0x64] sm:$0xf0] }
  0x10   : > { %v1036_v17 = vor.u32 %v1135_v15, %v1033_v16  ;;  %v1023_v20 = vld [vmem:[%s1532_s3 + $0xe0] sm:$0xf]  ;;  %s894_s13 = sshll.u32 %s1538_s11, 3  ;;  %581 = vmatpush.bf16.msra.mxu3 %v1032_v13  ;;  %v960_v21 = vor.u32 %v1118_v19, %v959_v18  ;;  %v1134_v22 = vld [vmem:[%s1532_s3 + $0xe4] sm:$0xf0] }
  0x11   : > { %v1117_v23 = vld [vmem:[%s1532_s3 + $0x64] sm:$0xf]  ;;  %s1301_s20 = scalar_lea.vmem %s1529_s0, %s894_s13  ;;  %v1024_v24 = vor.u32 %v1134_v22, %v1023_v20  ;;  %v961_v25 = vld [vmem:[%s1532_s3 + $0x68] sm:$0xf0]  ;;  %v951_v33 = vld [vmem:[%s1532_s3 + $0x50] sm:$0xf]  ;;  %s280_s26 = scalar_lea.vmem %s1536_s7, %s894_s13 }
  0x12   : > { %600 = vmatpush.bf16.msrb.mxu0 %v972_v14  ;;  %v1133_v26 = vld [vmem:[%s1532_s3 + $0xe4] sm:$0xf]  ;;  %v1025_v27 = vld [vmem:[%s1532_s3 + $0xe8] sm:$0xf0]  ;;  %v964_v30 = vor.u32 %v1117_v23, %v961_v25  ;;  %v1116_v34 = vld [vmem:[%s1532_s3 + $0x54] sm:$0xf0] }
  0x13   : > { %619 = vmatpush.bf16.msrb.mxu1 %v1036_v17  ;;  %v283_v28 = vld [vmem:[%s1301_s20] sm:$0xff]  ;;  %v284_v29 = vld [vmem:[%s1301_s20 + $0x8] sm:$0xff]  ;;  %v1028_v31 = vor.u32 %v1133_v26, %v1025_v27  ;;  %563 = vmatpush.bf16.msra.mxu2 %v960_v21  ;;  %v952_v35 = vor.u32 %v1116_v34, %v951_v33  ;;  %v1015_v36 = vld [vmem:[%s1532_s3 + $0xd0] sm:$0xf] }
  0x14   : > { %v287_v32 = vpack.c.bf16 %v284_v29, %v283_v28  ;;  %582 = vmatpush.bf16.msra.mxu3 %v1024_v24  ;;  %v1132_v37 = vld [vmem:[%s1532_s3 + $0xd4] sm:$0xf0]  ;;  %v1115_v38 = vld [vmem:[%s1532_s3 + $0x54] sm:$0xf]  ;;  %v953_v40 = vld [vmem:[%s1532_s3 + $0x58] sm:$0xf0] }
  0x15   : > { %v1016_v39 = vor.u32 %v1132_v37, %v1015_v36  ;;  %v1131_v41 = vld [vmem:[%s1532_s3 + $0xd4] sm:$0xf]  ;;  %v1017_v42 = vld [vmem:[%s1532_s3 + $0xd8] sm:$0xf0]  ;;  %v956_v43 = vor.u32 %v1115_v38, %v953_v40  ;;  %v943_v45 = vld [vmem:[%s1532_s3 + $0x40] sm:$0xf] }
  0x16   : > { %601 = vmatpush.bf16.msrb.mxu0 %v964_v30  ;;  %907 = vmatmul.msk.bf16.vlgmr.msra.gmra.mxu1 %vm307_vm0, %v287_v32  ;;  %v1020_v44 = vor.u32 %v1131_v41, %v1017_v42  ;;  %v1114_v46 = vld [vmem:[%s1532_s3 + $0x44] sm:$0xf0]  ;;  %v1007_v47 = vld [vmem:[%s1532_s3 + $0xc0] sm:$0xf]  ;;  %v1113_v50 = vld [vmem:[%s1532_s3 + $0x44] sm:$0xf] }
  0x17   : > { %905 = vmatmul.msk.bf16.vlgmr.msra.gmra.mxu0 %vm307_vm0, %v287_v32  ;;  %620 = vmatpush.bf16.msrb.mxu1 %v1028_v31  ;;  %v944_v48 = vor.u32 %v1114_v46, %v943_v45  ;;  %v1130_v49 = vld [vmem:[%s1532_s3 + $0xc4] sm:$0xf0]  ;;  %v945_v51 = vld [vmem:[%s1532_s3 + $0x48] sm:$0xf0]  ;;  %v1129_v54 = vld [vmem:[%s1532_s3 + $0xc4] sm:$0xf] }
  0x18   : > { %564 = vmatpush.bf16.msra.mxu2 %v952_v35  ;;  %583 = vmatpush.bf16.msra.mxu3 %v1016_v39  ;;  %v1008_v52 = vor.u32 %v1130_v49, %v1007_v47  ;;  %v948_v53 = vor.u32 %v1113_v50, %v945_v51  ;;  %v1009_v55 = vld [vmem:[%s1532_s3 + $0xc8] sm:$0xf0]  ;;  %v285_v57 = vld [vmem:[%s1301_s20 + $0x10] sm:$0xff]  ;;  %v286_v58 = vld [vmem:[%s1301_s20 + $0x18] sm:$0xff] }
  0x19   : > { %v1012_v56 = vor.u32 %v1129_v54, %v1009_v55  ;;  %v288_v59 = vpack.c.bf16 %v286_v58, %v285_v57  ;;  %v935_v60 = vld [vmem:[%s1532_s3 + $0x30] sm:$0xf]  ;;  %v1112_v61 = vld [vmem:[%s1532_s3 + $0x34] sm:$0xf0]  ;;  %v1111_v1 = vld [vmem:[%s1532_s3 + $0x34] sm:$0xf] }
  0x1a   : > { %602 = vmatpush.bf16.msrb.mxu0 %v956_v43  ;;  %v999_v62 = vld [vmem:[%s1532_s3 + $0xb0] sm:$0xf]  ;;  %v936_v63 = vor.u32 %v1112_v61, %v935_v60  ;;  %v1128_v0 = vld [vmem:[%s1532_s3 + $0xb4] sm:$0xf0]  ;;  %v937_v2 = vld [vmem:[%s1532_s3 + $0x38] sm:$0xf0] }
  0x1b   : > { %621 = vmatpush.bf16.msrb.mxu1 %v1020_v44  ;;  %v1000_v3 = vor.u32 %v1128_v0, %v999_v62  ;;  %v940_v4 = vor.u32 %v1111_v1, %v937_v2  ;;  %v1127_v5 = vld [vmem:[%s1532_s3 + $0xb4] sm:$0xf]  ;;  %v1001_v6 = vld [vmem:[%s1532_s3 + $0xb8] sm:$0xf0]  ;;  %v927_v8 = vld [vmem:[%s1532_s3 + $0x20] sm:$0xf] }
  0x1c   : > { %565 = vmatpush.bf16.msra.mxu2 %v944_v48  ;;  %584 = vmatpush.bf16.msra.mxu3 %v1008_v52  ;;  %v1004_v7 = vor.u32 %v1127_v5, %v1001_v6  ;;  %v1110_v9 = vld [vmem:[%s1532_s3 + $0x24] sm:$0xf0]  ;;  %v991_v11 = vld [vmem:[%s1532_s3 + $0xa0] sm:$0xf]  ;;  %v1109_v13 = vld [vmem:[%s1532_s3 + $0x24] sm:$0xf] }
  0x1d   : > { %v928_v10 = vor.u32 %v1110_v9, %v927_v8  ;;  %v1126_v12 = vld [vmem:[%s1532_s3 + $0xa4] sm:$0xf0]  ;;  %v929_v15 = vld [vmem:[%s1532_s3 + $0x28] sm:$0xf0]  ;;  %v1125_v16 = vld [vmem:[%s1532_s3 + $0xa4] sm:$0xf] }
  0x1e   : > { %603 = vmatpush.bf16.msrb.mxu0 %v948_v53  ;;  %v992_v14 = vor.u32 %v1126_v12, %v991_v11  ;;  %v993_v17 = vld [vmem:[%s1532_s3 + $0xa8] sm:$0xf0]  ;;  %v932_v18 = vor.u32 %v1109_v13, %v929_v15  ;;  %v919_v20 = vld [vmem:[%s1532_s3 + $0x10] sm:$0xf]  ;;  %v1108_v21 = vld [vmem:[%s1532_s3 + $0x14] sm:$0xf0] }
  0x1f   : > { %622 = vmatpush.bf16.msrb.mxu1 %v1012_v56  ;;  %v996_v19 = vor.u32 %v1125_v16, %v993_v17  ;;  %v983_v22 = vld [vmem:[%s1532_s3 + $0x90] sm:$0xf]  ;;  %v920_v23 = vor.u32 %v1108_v21, %v919_v20  ;;  %v1124_v24 = vld [vmem:[%s1532_s3 + $0x94] sm:$0xf0]  ;;  %v1107_v25 = vld [vmem:[%s1532_s3 + $0x14] sm:$0xf] }
  0x20   : > { %566 = vmatpush.bf16.msra.mxu2 %v936_v63  ;;  %585 = vmatpush.bf16.msra.mxu3 %v1000_v3  ;;  %v921_v26 = vld [vmem:[%s1532_s3 + $0x18] sm:$0xf0]  ;;  %v984_v27 = vor.u32 %v1124_v24, %v983_v22  ;;  %v1123_v29 = vld [vmem:[%s1532_s3 + $0x94] sm:$0xf]  ;;  %v911_v32 = vld [vmem:[%s1532_s3] sm:$0xf] }
  0x21   : > { %v924_v28 = vor.u32 %v1107_v25, %v921_v26  ;;  %v985_v30 = vld [vmem:[%s1532_s3 + $0x98] sm:$0xf0]  ;;  %v1106_v33 = vld [vmem:[%s1532_s3 + $0x4] sm:$0xf0]  ;;  %v975_v34 = vld [vmem:[%s1532_s3 + $0x80] sm:$0xf] }
  0x22   : > { %604 = vmatpush.bf16.msrb.mxu0 %v940_v4  ;;  %v988_v31 = vor.u32 %v1123_v29, %v985_v30  ;;  %v912_v35 = vor.u32 %v1106_v33, %v911_v32  ;;  %v1122_v36 = vld [vmem:[%s1532_s3 + $0x84] sm:$0xf0]  ;;  %v1105_v37 = vld [vmem:[%s1532_s3 + $0x4] sm:$0xf]  ;;  %v913_v38 = vld [vmem:[%s1532_s3 + $0x8] sm:$0xf0] }
  0x23   : > { %623 = vmatpush.bf16.msrb.mxu1 %v1004_v7  ;;  %v976_v39 = vor.u32 %v1122_v36, %v975_v34  ;;  %v916_v40 = vor.u32 %v1105_v37, %v913_v38  ;;  %v1121_v41 = vld [vmem:[%s1532_s3 + $0x84] sm:$0xf]  ;;  %v977_v42 = vld [vmem:[%s1532_s3 + $0x88] sm:$0xf0]  ;;  %v291_v44 = vld [vmem:[%s1531_s2] sm:$0x3] }
  0x24   : > { %567 = vmatpush.bf16.msra.mxu2 %v928_v10  ;;  %586 = vmatpush.bf16.msra.mxu3 %v992_v14  ;;  %v980_v43 = vor.u32 %v1121_v41, %v977_v42  ;;  %v1152_v47 = vld [vmem:[%s1534_s5 + $0x78] sm:$0xff]  ;;  %v1151_v49 = vld [vmem:[%s1534_s5 + $0x70] sm:$0xff]  ;;  %v293_v51 = vperm.slane %v291_v44, 0  ;;  %v294_v52 = vperm.slane %v291_v44, 1  ;;  %v1150_v53 = vld [vmem:[%s1534_s5 + $0x68] sm:$0xff] }
  0x25   : > { %v1144_v48 = vld [vmem:[%s1534_s5 + $0x38] sm:$0xff]  ;;  %v1143_v50 = vld [vmem:[%s1534_s5 + $0x30] sm:$0xff]  ;;  %v1149_v60 = vld [vmem:[%s1534_s5 + $0x60] sm:$0xff] }
  0x26   : > { %908 = vmatmul.msk.bf16.gmra.mxu1 %vm307_vm0, %v288_v59  ;;  %605 = vmatpush.bf16.msrb.mxu0 %v932_v18  ;;  %v1142_v17 = vld [vmem:[%s1534_s5 + $0x28] sm:$0xff]  ;;  %v1148_v18 = vld [vmem:[%s1534_s5 + $0x58] sm:$0xff]  ;;  %v1147_v20 = vld [vmem:[%s1534_s5 + $0x50] sm:$0xff] }
  0x27   : > { %906 = vmatmul.msk.bf16.gmra.mxu0 %vm307_vm0, %v288_v59  ;;  %624 = vmatpush.bf16.msrb.mxu1 %v996_v19  ;;  %v1141_v19 = vld [vmem:[%s1534_s5 + $0x20] sm:$0xff]  ;;  %v1140_v21 = vld [vmem:[%s1534_s5 + $0x18] sm:$0xff]  ;;  %v1146_v22 = vld [vmem:[%s1534_s5 + $0x48] sm:$0xff] }
  0x28   : > { %568 = vmatpush.bf16.msra.mxu2 %v920_v23  ;;  %587 = vmatpush.bf16.msra.mxu3 %v984_v27  ;;  %v1139_v23 = vld [vmem:[%s1534_s5 + $0x10] sm:$0xff]  ;;  %v1145_v24 = vld [vmem:[%s1534_s5 + $0x40] sm:$0xff]  ;;  %v1138_v25 = vld [vmem:[%s1534_s5 + $0x8] sm:$0xff] }
  0x29   : > { %v1137_v26 = vld [vmem:[%s1534_s5] sm:$0xff] }
  0x2a   : > { %606 = vmatpush.bf16.msrb.mxu0 %v924_v28  ;;  %v396_v27 = vld [vmem:[%s1533_s4] sm:$0x3] }
  0x2b   : > { %625 = vmatpush.bf16.msrb.mxu1 %v988_v31  ;;  %v399_v30 = vperm.slane %v396_v27, 1  ;;  %v398_v34 = vperm.slane %v396_v27, 0 }
  0x2c   : > { %569 = vmatpush.bf16.msra.mxu2 %v912_v35  ;;  %588 = vmatpush.bf16.msra.mxu3 %v976_v39 }
  0x2e   : > { %607 = vmatpush.bf16.msrb.mxu0 %v916_v40 }
  0x2f   : > { %626 = vmatpush.bf16.msrb.mxu1 %v980_v43 }
  0x30   : > { %1161 = vmatpush.bf16.msrb.mxu3 %v1152_v47  ;;  %1153 = vmatpush.bf16.msrb.mxu2 %v1144_v48 }
  0x32   : > { %782 = vmatpush.bf16.msra.mxu0 %v1144_v48 }
  0x33   : > { %801 = vmatpush.bf16.msra.mxu1 %v1152_v47 }
  0x34   : > { %1162 = vmatpush.bf16.msrb.mxu3 %v1151_v49  ;;  %1154 = vmatpush.bf16.msrb.mxu2 %v1143_v50 }
  0x36   : > { %783 = vmatpush.bf16.msra.mxu0 %v1143_v50 }
  0x37   : > { %802 = vmatpush.bf16.msra.mxu1 %v1151_v49 }
  0x38   : > { %1163 = vmatpush.bf16.msrb.mxu3 %v1150_v53  ;;  %1155 = vmatpush.bf16.msrb.mxu2 %v1142_v17 }
  0x3a   : > { %784 = vmatpush.bf16.msra.mxu0 %v1142_v17 }
  0x3b   : > { %803 = vmatpush.bf16.msra.mxu1 %v1150_v53 }
  0x3c   : > { %1164 = vmatpush.bf16.msrb.mxu3 %v1149_v60  ;;  %1156 = vmatpush.bf16.msrb.mxu2 %v1141_v19 }
  0x3e   : > { %785 = vmatpush.bf16.msra.mxu0 %v1141_v19 }
  0x3f   : > { %804 = vmatpush.bf16.msra.mxu1 %v1149_v60 }
  0x40   : > { %1165 = vmatpush.bf16.msrb.mxu3 %v1148_v18  ;;  %1157 = vmatpush.bf16.msrb.mxu2 %v1140_v21 }
  0x42   : > { %786 = vmatpush.bf16.msra.mxu0 %v1140_v21 }
  0x43   : > { %805 = vmatpush.bf16.msra.mxu1 %v1148_v18 }
  0x44   : > { %1166 = vmatpush.bf16.msrb.mxu3 %v1147_v20  ;;  %1158 = vmatpush.bf16.msrb.mxu2 %v1139_v23 }
  0x46   : > { %787 = vmatpush.bf16.msra.mxu0 %v1139_v23 }
  0x47   : > { %806 = vmatpush.bf16.msra.mxu1 %v1147_v20 }
  0x48   : > { %1167 = vmatpush.bf16.msrb.mxu3 %v1146_v22  ;;  %1159 = vmatpush.bf16.msrb.mxu2 %v1138_v25 }
  0x4a   : > { %788 = vmatpush.bf16.msra.mxu0 %v1138_v25 }
  0x4b   : > { %807 = vmatpush.bf16.msra.mxu1 %v1146_v22 }
  0x4c   : > { %1168 = vmatpush.bf16.msrb.mxu3 %v1145_v24  ;;  %1160 = vmatpush.bf16.msrb.mxu2 %v1137_v26 }
  0x4e   : > { %789 = vmatpush.bf16.msra.mxu0 %v1137_v26 }
  0x4f   : > { %808 = vmatpush.bf16.msra.mxu1 %v1145_v24 }
  0x93   : > { %v342_v46 = vpop.f32.mrf.mxu1 }
  0x94   : > { %v323_v45 = vpop.f32.mrf.mxu0  ;;  %v343_v55 = vadd.f32 %v342_v46, %v294_v52 }
  0x95   : > { %v324_v54 = vadd.f32 %v323_v45, %v293_v51 }
  0x96   : > { %v353_v62 = vmax.f32 %v343_v55, 0.0 }
  0x97   : > { %v352_v61 = vmax.f32 %v324_v54, 0.0 }
  0x9b   : > { %v344_v57 = vpop.f32.mrf.mxu1 }
  0x9c   : > { %v325_v56 = vpop.f32.mrf.mxu0  ;;  %v345_v59 = vadd.f32 %v344_v57, %v294_v52 }
  0x9d   : > { %v326_v58 = vadd.f32 %v325_v56, %v293_v51 }
  0x9e   : > { %v355_v0 = vmax.f32 %v345_v59, 0.0 }
  0x9f   : > { %v354_v63 = vmax.f32 %v326_v58, 0.0 }
  0xa0   : > { %v361_v2 = vpack.c.bf16 %v355_v0, %v353_v62 }
  0xa1   : > { %v360_v1 = vpack.c.bf16 %v354_v63, %v352_v61 }
  0xa2   : > { %589 = vmatmul.bf16.vlgmr.msra.gmra.mxu3 %v361_v2  ;;  %627 = vmatmul.bf16.vlgmr.msrb.gmra.mxu1 %v361_v2 }
  0xa3   : > { %570 = vmatmul.bf16.vlgmr.msra.gmra.mxu2 %v360_v1  ;;  %608 = vmatmul.bf16.vlgmr.msrb.gmra.mxu0 %v360_v1  ;;  %v347_v4 = vpop.f32.mrf.mxu1 }
  0xa4   : > { %v328_v3 = vpop.f32.mrf.mxu0  ;;  %v348_v6 = vadd.f32 %v347_v4, %v294_v52 }
  0xa5   : > { %v329_v5 = vadd.f32 %v328_v3, %v293_v51 }
  0xa6   : > { %v357_v12 = vmax.f32 %v348_v6, 0.0 }
  0xa7   : > { %v356_v11 = vmax.f32 %v329_v5, 0.0 }
  0xab   : > { %v349_v8 = vpop.f32.mrf.mxu1 }
  0xac   : > { %v330_v7 = vpop.f32.mrf.mxu0  ;;  %v350_v10 = vadd.f32 %v349_v8, %v294_v52 }
  0xad   : > { %v331_v9 = vadd.f32 %v330_v7, %v293_v51 }
  0xae   : > { %v359_v14 = vmax.f32 %v350_v10, 0.0  ;;  %v1177_v10 = vld [vmem:[%s1535_s6] ss:$0 sm:$0xff] }
  0xaf   : > { %v358_v13 = vmax.f32 %v331_v9, 0.0 }
  0xb0   : > { %v363_v16 = vpack.c.bf16 %v359_v14, %v357_v12 }
  0xb1   : > { %v362_v15 = vpack.c.bf16 %v358_v13, %v356_v11 }
  0xb2   : > { %594 = vmatmul.bf16.gmra.mxu3 %v363_v16  ;;  %632 = vmatmul.bf16.gmra.mxu1 %v363_v16 }
  0xb3   : > { %575 = vmatmul.bf16.gmra.mxu2 %v362_v15  ;;  %613 = vmatmul.bf16.gmra.mxu0 %v362_v15 }
 0x11f   : > { %v628_v29 = vpop.f32.mrf.mxu1 }
 0x120   : > { %v609_v28 = vpop.f32.mrf.mxu0 }
 0x121   : > { %v610_v31 = vadd.f32 %v609_v28, %v399_v30 }
 0x123   : > { %v629_v37 = vadd.f32 %v628_v29, %v610_v31 }
 0x125   : > { %v590_v33 = vpop.f32.mrf.mxu3  ;;  %v639_v41 = vmax.f32 %v629_v37, 0.0 }
 0x126   : > { %v571_v32 = vpop.f32.mrf.mxu2 }
 0x127   : > { %v630_v36 = vpop.f32.mrf.mxu1  ;;  %v572_v39 = vadd.f32 %v571_v32, %v398_v34 }
 0x128   : > { %v611_v35 = vpop.f32.mrf.mxu0 }
 0x129   : > { %v612_v38 = vadd.f32 %v611_v35, %v399_v30  ;;  %v591_v45 = vadd.f32 %v590_v33, %v572_v39 }
 0x12b   : > { %v631_v40 = vadd.f32 %v630_v36, %v612_v38  ;;  %v638_v51 = vmax.f32 %v591_v45, 0.0 }
 0x12d   : > { %v641_v42 = vmax.f32 %v631_v40, 0.0  ;;  %v592_v44 = vpop.f32.mrf.mxu3 }
 0x12e   : > { %v573_v43 = vpop.f32.mrf.mxu2 }
 0x12f   : > { %v574_v46 = vadd.f32 %v573_v43, %v398_v34  ;;  %v647_v47 = vpack.c.bf16 %v641_v42, %v639_v41  ;;  %v633_v50 = vpop.f32.mrf.mxu1 }
 0x130   : > { %v614_v49 = vpop.f32.mrf.mxu0 }
 0x131   : > { %v593_v48 = vadd.f32 %v592_v44, %v574_v46  ;;  %809 = vmatmul.bf16.vlgmr.msra.gmra.mxu1 %v647_v47  ;;  %v615_v54 = vadd.f32 %v614_v49, %v399_v30 }
 0x133   : > { %v640_v52 = vmax.f32 %v593_v48, 0.0  ;;  %v634_v58 = vadd.f32 %v633_v50, %v615_v54 }
 0x135   : > { %v646_v53 = vpack.c.bf16 %v640_v52, %v638_v51  ;;  %v595_v56 = vpop.f32.mrf.mxu3  ;;  %v643_v63 = vmax.f32 %v634_v58, 0.0 }
 0x136   : > { %v576_v55 = vpop.f32.mrf.mxu2 }
 0x137   : > { %790 = vmatmul.bf16.vlgmr.msra.gmra.mxu0 %v646_v53  ;;  %v577_v60 = vadd.f32 %v576_v55, %v398_v34  ;;  %v635_v61 = vpop.f32.mrf.mxu1 }
 0x138   : > { %v616_v57 = vpop.f32.mrf.mxu0 }
 0x139   : > { %v617_v59 = vadd.f32 %v616_v57, %v399_v30  ;;  %v596_v2 = vadd.f32 %v595_v56, %v577_v60 }
 0x13b   : > { %v636_v62 = vadd.f32 %v635_v61, %v617_v59  ;;  %v642_v7 = vmax.f32 %v596_v2, 0.0 }
 0x13d   : > { %v645_v0 = vmax.f32 %v636_v62, 0.0  ;;  %v597_v5 = vpop.f32.mrf.mxu3 }
 0x13e   : > { %v578_v1 = vpop.f32.mrf.mxu2 }
 0x13f   : > { %v579_v3 = vadd.f32 %v578_v1, %v398_v34  ;;  %v649_v4 = vpack.c.bf16 %v645_v0, %v643_v63 }
 0x141   : > { %v598_v6 = vadd.f32 %v597_v5, %v579_v3  ;;  %814 = vmatmul.bf16.vlgmr.msrb.gmra.mxu3 %v649_v4 }
 0x143   : > { %v644_v8 = vmax.f32 %v598_v6, 0.0 }
 0x145   : > { %v648_v9 = vpack.c.bf16 %v644_v8, %v642_v7 }
 0x147   : > { %795 = vmatmul.bf16.vlgmr.msrb.gmra.mxu2 %v648_v9 }
 0x1ae   : > { %v810_v11 = vpop.f32.mrf.mxu1 }
 0x1b4   : > { %v791_v12 = vpop.f32.mrf.mxu0 }
 0x1b5   : > { %v792_v13 = vadd.f32 %v1177_v10, %v791_v12 }
 0x1b6   : > { %v812_v17 = vpop.f32.mrf.mxu1 }
 0x1b7   : > { %v811_v14 = vadd.f32 %v810_v11, %v792_v13 }
 0x1b9   : > { %1178 = vtanh.f32 %v811_v14 }
 0x1bc   : > { %v793_v15 = vpop.f32.mrf.mxu0 }
 0x1bd   : > { %v794_v16 = vadd.f32 %v1177_v10, %v793_v15 }
 0x1bf   : > { %v1179_v18 = vpop.eup %1178  ;;  %v813_v19 = vadd.f32 %v812_v17, %v794_v16 }
 0x1c0   : > { %v824_v20 = vmul.f32 2.0, %v1179_v18 }
 0x1c1   : > { %1180 = vtanh.f32 %v813_v19 }
 0x1c2   : > { %828 = vst [vmem:[%s280_s26] sm:$0xff] %v824_v20 }
 0x1c4   : > { %v815_v23 = vpop.f32.mrf.mxu3 }
 0x1c7   : > { %v1181_v21 = vpop.eup %1180 }
 0x1c8   : > { %v825_v22 = vmul.f32 2.0, %v1181_v21 }
 0x1ca   : > { %829 = vst [vmem:[%s280_s26 + $0x8] sm:$0xff] %v825_v22  ;;  %v796_v24 = vpop.f32.mrf.mxu2 }
 0x1cb   : > { %v797_v25 = vadd.f32 %v1177_v10, %v796_v24 }
 0x1cc   : > { %v817_v29 = vpop.f32.mrf.mxu3 }
 0x1cd   : > { %v816_v26 = vadd.f32 %v815_v23, %v797_v25 }
 0x1cf   : > { %1182 = vtanh.f32 %v816_v26 }
 0x1d2   : > { %v798_v27 = vpop.f32.mrf.mxu2 }
 0x1d3   : > { %v799_v28 = vadd.f32 %v1177_v10, %v798_v27 }
 0x1d5   : > { %v1183_v30 = vpop.eup %1182  ;;  %v818_v31 = vadd.f32 %v817_v29, %v799_v28 }
 0x1d6   : > { %v826_v32 = vmul.f32 2.0, %v1183_v30 }
 0x1d7   : > { %1184 = vtanh.f32 %v818_v31 }
 0x1d8   : > { %830 = vst [vmem:[%s280_s26 + $0x10] sm:$0xff] %v826_v32 }
 0x1dd   : > { %v1185_v33 = vpop.eup %1184 }
 0x1de   : > { %v827_v34 = vmul.f32 2.0, %v1185_v33 }
 0x1e0   : > { %831 = vst [vmem:[%s280_s26 + $0x18] sm:$0xff] %v827_v34 }
 0x1e1 PF: > { %s17_s24 = sadd.s32 1, %s1192_s24  }
 0x1e2   : > { %p14_p4 = scmp.ge.s32.totalorder %s17_s24, 4  }
 0x1e4   :  { %16 = sbr.rel (!%p14_p4) target bundleno = 1 (0x1), region = 78 }

</bundles_post_ra>
